<compile_context>
chip_gen: v7x
topology: tpu7x:2x2x1
jax: 0.10.0
libtpu: 0.0.40
codegen_flags: <defaults>
</compile_context>

<pallas_src>
import functools

import jax
import jax.numpy as jnp
from jax import lax
from jax.experimental import pallas as pl
from jax.experimental.pallas import tpu as pltpu

LANES = 128


def _device_params():
    """Per-generation tuning: (per-input block byte budget, max TensorCores)."""
    kind = ""
    try:
        kind = jax.devices()[0].device_kind.lower()
    except Exception:
        pass
    if "v7" in kind:
        # 3.2 TB/s HBM, 2 TCs/chip, 64 MiB VMEM/TC: 4 MiB blocks
        # (2 inputs x 2 buffers x 4 MiB = 16 MiB), split across both cores.
        return 4 << 20, 2
    if "v5 lite" in kind or "v5e" in kind or "v5lite" in kind:
        # default scoped VMEM is only 16 MiB: keep 2 inputs x 2 bufs x 2 MiB.
        return 2 << 20, 1
    # v6e / unknown: 4 MiB blocks fit the 32 MiB default scoped VMEM.
    return 4 << 20, 1


def _charbonnier_kernel(x_ref, y_ref, out_ref, acc_ref, *,
                        eps, num_tiles, tiles_per_core, tail_valid):
    c = pl.program_id(0)               # core / partial-sum index ("parallel")
    i = pl.program_id(1)               # tile index within this core
    t = c * tiles_per_core + i         # logical (un-clamped) tile index

    @pl.when(i == 0)
    def _init():
        acc_ref[...] = jnp.zeros_like(acc_ref)

    def _tile_values():
        # Upcast narrow dtypes (bf16 / fp8) in-kernel only; DMA stays narrow.
        diff = x_ref[...].astype(jnp.float32) - y_ref[...].astype(jnp.float32)
        return jnp.sqrt(diff * diff + jnp.float32(eps))

    def _accumulate(val):
        # (row_tile, 128) -> (row_tile//8, 8, 128): exact vreg boundaries, so
        # the reshape is a free layout op and the sum is pure VPU adds into a
        # single vreg-resident accumulator (no per-vreg acc load/store).
        acc_ref[...] += val.reshape(-1, 8, LANES).sum(axis=0)

    if tail_valid is None:
        # Every logical tile is fully valid: single fast path.  Duplicated
        # (clamped) tiles on the second core are skipped entirely.
        @pl.when(t < num_tiles)
        def _all_tiles():
            _accumulate(_tile_values())
    else:
        # Interior tiles: plain accumulate, no iota / compare / select.
        @pl.when(t < num_tiles - 1)
        def _interior():
            _accumulate(_tile_values())

        # Last logical tile: mask padded lanes and unread (garbage) rows of
        # the partial block to exactly 0 with a select.  The tile-local flat
        # index is < row_tile*128, so this never overflows int32.
        @pl.when(t == num_tiles - 1)
        def _tail():
            val = _tile_values()
            row = lax.broadcasted_iota(jnp.int32, val.shape, 0)
            lane = lax.broadcasted_iota(jnp.int32, val.shape, 1)
            local = row * LANES + lane
            val = jnp.where(local < tail_valid, val, jnp.float32(0.0))
            _accumulate(val)

    @pl.when(i == tiles_per_core - 1)
    def _finalize():
        out_ref[0, 0] = jnp.sum(acc_ref[...])   # one XLU reduce of one vreg


def charbonnier_loss(x, y, eps=1e-6, reduction="mean"):
    assert x.shape == y.shape, (x.shape, y.shape)
    n = x.size
    if n == 0:
        return jnp.float32(jnp.nan) if reduction == "mean" else jnp.float32(0.0)

    xf = jnp.ravel(x)
    yf = jnp.ravel(y)

    # View as a lane-major 2-D slab. ravel/reshape are layout-preserving; a
    # real pad (one HBM copy) only happens when numel % 128 != 0, and the
    # padded tail is masked to exactly 0 inside the kernel.
    rem = n % LANES
    if rem:
        xf = jnp.pad(xf, (0, LANES - rem))
        yf = jnp.pad(yf, (0, LANES - rem))
    rows = xf.size // LANES
    x2 = xf.reshape(rows, LANES)
    y2 = yf.reshape(rows, LANES)

    # dtype-aware sublane packing: 8 for 4-byte, 16 for 2-byte, 32 for 1-byte.
    itemsize = jnp.dtype(x.dtype).itemsize
    sublane = max(8, 32 // max(1, itemsize))

    block_budget, max_cores = _device_params()
    cap = max(sublane,
              (block_budget // (LANES * itemsize)) // sublane * sublane)
    row_tile = min(cap, ((rows + sublane - 1) // sublane) * sublane)
    num_tiles = pl.cdiv(rows, row_tile)

    # Split across TensorCores only where it can actually run concurrently
    # (v7x) and only when there are enough tiles to make it worthwhile.
    num_cores = max_cores if num_tiles >= 8 else 1
    num_cores = max(1, min(num_cores, num_tiles))
    tiles_per_core = pl.cdiv(num_tiles, num_cores)

    # Valid element count inside the last logical tile (Python int, so no
    # int32 wrap even for > 2^31 total elements); None => no masking needed.
    tile_elems = row_tile * LANES
    last_valid = n - (num_tiles - 1) * tile_elems
    tail_valid = None if last_valid == tile_elems else last_valid

    def data_map(c, i):
        # Clamp duplicated / out-of-range tiles (skipped in-kernel) to the
        # last block index so the pipeline does not re-fetch them from HBM.
        return (jnp.minimum(c * tiles_per_core + i, num_tiles - 1), 0)

    kernel = functools.partial(
        _charbonnier_kernel,
        eps=float(eps), num_tiles=num_tiles,
        tiles_per_core=tiles_per_core, tail_valid=tail_valid)

    partials = pl.pallas_call(
        kernel,
        out_shape=jax.ShapeDtypeStruct((num_cores, 1), jnp.float32),
        grid=(num_cores, tiles_per_core),
        in_specs=[
            pl.BlockSpec((row_tile, LANES), data_map),
            pl.BlockSpec((row_tile, LANES), data_map),
        ],
        out_specs=pl.BlockSpec((1, 1), lambda c, i: (c, 0),
                               memory_space=pltpu.SMEM),
        scratch_shapes=[pltpu.VMEM((8, LANES), jnp.float32)],
        compiler_params=pltpu.CompilerParams(
            dimension_semantics=("parallel", "arbitrary")),
    )(x2, y2)

    total = jnp.sum(partials)
    if reduction == "mean":
        return total / jnp.float32(n)
    return total


if __name__ == "__main__":
    key = jax.random.PRNGKey(0)
    kx, ky = jax.random.split(key)

    # Main check: shapes consistent with the module's typical use.
    x = jax.random.normal(kx, (2, 4, 16, 16), dtype=jnp.float32)
    y = jax.random.normal(ky, (2, 4, 16, 16), dtype=jnp.float32)
    out = charbonnier_loss(x, y, eps=1e-6, reduction="mean")
    out = jax.block_until_ready(out)
    ref = jnp.mean(jnp.sqrt(jnp.square(x - y) + 1e-6))
    assert jnp.allclose(out, ref, rtol=1e-5, atol=1e-5), (out, ref)

    # Exercise the tail-mask path (numel not a multiple of 128) and "sum".
    x2 = jax.random.normal(kx, (3, 5, 7, 11), dtype=jnp.float32)
    y2 = jax.random.normal(ky, (3, 5, 7, 11), dtype=jnp.float32)
    out2 = jax.block_until_ready(charbonnier_loss(x2, y2, reduction="sum"))
    ref2 = jnp.sum(jnp.sqrt(jnp.square(x2 - y2) + 1e-6))
    assert jnp.allclose(out2, ref2, rtol=1e-5, atol=1e-5), (out2, ref2)

    print("KERNEL_OK")
</pallas_src>

<mosaic_0001>
module attributes {stable_mosaic.version = 11 : i64} {
  func.func @_charbonnier_kernel(%arg0: i32, %arg1: i32, %arg2: memref<16x128xf32, #tpu.memory_space<vmem>>, %arg3: memref<16x128xf32, #tpu.memory_space<vmem>>, %arg4: memref<1x1xf32, #tpu.memory_space<smem>>, %arg5: memref<8x128xf32, #tpu.memory_space<vmem>>) attributes {dimension_semantics = [#tpu.dimension_semantics<parallel>, #tpu.dimension_semantics<arbitrary>], iteration_bounds = array<i64: 1, 1>, scalar_prefetch = 0 : i64, scratch_operands = 1 : i64, tpu.core_type = #tpu.core_type<tc>, window_params = [{transform_indices = @transform_0, window_bounds = array<i64: 16, 128>}, {transform_indices = @transform_1, window_bounds = array<i64: 16, 128>}, {transform_indices = @transform_2, window_bounds = array<i64: 1, 1>}]} {
    %c1_i32 = arith.constant 1 : i32
    %0 = arith.muli %arg0, %c1_i32 : i32
    %1 = arith.addi %0, %arg1 : i32
    %c0_i32 = arith.constant 0 : i32
    %2 = arith.cmpi eq, %arg1, %c0_i32 : i32
    %3 = arith.extui %2 : i1 to i32
    %c0_i32_0 = arith.constant 0 : i32
    %4 = arith.cmpi ne, %3, %c0_i32_0 : i32
    scf.if %4 {
      %cst = arith.constant 0.000000e+00 : f32
      %11 = vector.broadcast %cst : f32 to vector<8x128xf32>
      %c0 = arith.constant 0 : index
      %c0_5 = arith.constant 0 : index
      %12 = vector.load %arg5[%c0, %c0_5] : memref<8x128xf32, #tpu.memory_space<vmem>>, vector<8x128xf32>
      tpu.vector_store %arg5[%c0, %c0_5], %11 {strides = array<i32>} : memref<8x128xf32, #tpu.memory_space<vmem>>, vector<8x128xf32>,
    } else {
    }
    %c1_i32_1 = arith.constant 1 : i32
    %5 = arith.cmpi slt, %1, %c1_i32_1 : i32
    %6 = arith.extui %5 : i1 to i32
    %c0_i32_2 = arith.constant 0 : i32
    %7 = arith.cmpi ne, %6, %c0_i32_2 : i32
    scf.if %7 {
      %c0 = arith.constant 0 : index
      %c0_5 = arith.constant 0 : index
      %11 = vector.load %arg2[%c0, %c0_5] : memref<16x128xf32, #tpu.memory_space<vmem>>, vector<16x128xf32>
      %c0_6 = arith.constant 0 : index
      %c0_7 = arith.constant 0 : index
      %12 = vector.load %arg3[%c0_6, %c0_7] : memref<16x128xf32, #tpu.memory_space<vmem>>, vector<16x128xf32>
      %13 = arith.subf %11, %12 : vector<16x128xf32>
      %14 = arith.mulf %13, %13 : vector<16x128xf32>
      %cst = arith.constant 9.99999997E-7 : f32
      %15 = vector.broadcast %cst : f32 to vector<16x128xf32>
      %16 = arith.addf %14, %15 : vector<16x128xf32>
      %17 = math.sqrt %16 : vector<16x128xf32>
      %c0_8 = arith.constant 0 : index
      %c0_9 = arith.constant 0 : index
      %18 = vector.load %arg5[%c0_8, %c0_9] : memref<8x128xf32, #tpu.memory_space<vmem>>, vector<8x128xf32>
      %19 = vector.shape_cast %17 : vector<16x128xf32> to vector<2x8x128xf32>
      %cst_10 = arith.constant dense<0.000000e+00> : vector<8x128xf32>
      %20 = vector.multi_reduction <add>, %19, %cst_10 [0] : vector<2x8x128xf32> to vector<8x128xf32>
      %21 = arith.addf %18, %20 : vector<8x128xf32>
      %c0_11 = arith.constant 0 : index
      %c0_12 = arith.constant 0 : index
      %22 = vector.load %arg5[%c0_11, %c0_12] : memref<8x128xf32, #tpu.memory_space<vmem>>, vector<8x128xf32>
      tpu.vector_store %arg5[%c0_11, %c0_12], %21 {strides = array<i32>} : memref<8x128xf32, #tpu.memory_space<vmem>>, vector<8x128xf32>,
    } else {
    }
    %c0_i32_3 = arith.constant 0 : i32
    %8 = arith.cmpi eq, %arg1, %c0_i32_3 : i32
    %9 = arith.extui %8 : i1 to i32
    %c0_i32_4 = arith.constant 0 : i32
    %10 = arith.cmpi ne, %9, %c0_i32_4 : i32
    scf.if %10 {
      %c0 = arith.constant 0 : index
      %c0_5 = arith.constant 0 : index
      %11 = vector.load %arg5[%c0, %c0_5] : memref<8x128xf32, #tpu.memory_space<vmem>>, vector<8x128xf32>
      %12 = vector.shape_cast %11 : vector<8x128xf32> to vector<1x8x128xf32>
      %cst = arith.constant dense<0.000000e+00> : vector<1xf32>
      %13 = vector.multi_reduction <add>, %12, %cst [1, 2] : vector<1x8x128xf32> to vector<1xf32>
      %14 = vector.shape_cast %13 : vector<1xf32> to vector<1x1x1xf32>
      %15 = vector.extract %14[0, 0, 0] : f32 from vector<1x1x1xf32>
      %c0_6 = arith.constant 0 : index
      %c0_7 = arith.constant 0 : index
      %16 = memref.load %arg4[%c0_6, %c0_7] : memref<1x1xf32, #tpu.memory_space<smem>>
      memref.store %15, %arg4[%c0_6, %c0_7] : memref<1x1xf32, #tpu.memory_space<smem>>
    } else {
    }
    return
  }
  func.func @transform_0(%arg0: i32, %arg1: i32) -> (i32, i32) {
    %c1_i32 = arith.constant 1 : i32
    %0 = arith.muli %arg0, %c1_i32 : i32
    %1 = arith.addi %0, %arg1 : i32
    %c0_i32 = arith.constant 0 : i32
    %2 = arith.minsi %1, %c0_i32 : i32
    %c0_i32_0 = arith.constant 0 : i32
    %c0_i32_1 = arith.constant 0 : i32
    return %2, %c0_i32_0 : i32, i32
  }
  func.func @transform_1(%arg0: i32, %arg1: i32) -> (i32, i32) {
    %c1_i32 = arith.constant 1 : i32
    %0 = arith.muli %arg0, %c1_i32 : i32
    %1 = arith.addi %0, %arg1 : i32
    %c0_i32 = arith.constant 0 : i32
    %2 = arith.minsi %1, %c0_i32 : i32
    %c0_i32_0 = arith.constant 0 : i32
    %c0_i32_1 = arith.constant 0 : i32
    return %2, %c0_i32_0 : i32, i32
  }
  func.func @transform_2(%arg0: i32, %arg1: i32) -> (i32, i32) {
    %c0_i32 = arith.constant 0 : i32
    %c0_i32_0 = arith.constant 0 : i32
    return %arg0, %c0_i32 : i32, i32
  }
}

</mosaic_0001>

<bundles_post_ra>
// kernel: tpu_custom_call.1
= control target key start
LH: loop header
LB: loop body
LE: loop exit
PB: predicated region body
PF: predicated region fallthrough
CT: control target
= control target key end

     0   :  { %7 = vsyncpa [#allocation4], 0  ;;  %s259_s0 = inlined_call_operand.hbm [shape: f32[16,128], index: 0, kind: input, shape index: {}]   ;;  %s260_s1 = inlined_call_operand.hbm [shape: f32[16,128], index: 1, kind: input, shape index: {}]   ;;  %s261_s2 = inlined_call_operand.hbm [shape: f32[1,1], index: 2, kind: output, shape index: {}]  }
   0x1   :  { %8 = vsyncpa [#allocation7], 0 }
   0x2   :  { %9 = vsyncpa [#allocation5], 0  ;;  %s203_s9 = smov [#allocation3]   ;;  %s143_s13 = scalar_lea.hbm %s259_s0, 256 }
   0x3   :  { %s21_s10 = sshll.u32 %s203_s9, 4  ;;  %p144_p0 = scmp.ne.s32.totalorder %s259_s0, %s143_s13  ;;  %s22_s10 = int_to_ptr.vmem [resolvable:$true] %s21_s10 }
   0x4   :  { %p147_p1 = scmp.lt.u32.totalorder %s143_s13, %s259_s0 }
   0x6   :  { %p149_p2 = pnand %p147_p1, %p144_p0 }
   0x8   :  { %152 = shalt.err (!%p149_p2)
}
   0x9   :  { %s153_s18 = scalar_lea.vmem %s22_s10, 256  ;;  %p158_p4 = scmp.lt.s32.totalorder %s22_s10, %s22_s10 }
   0xa   :  { %p154_p3 = scmp.ne.s32.totalorder %s22_s10, %s153_s18  ;;  %p159_p5 = scmp.lt.s32.totalorder %s153_s18, %s153_s18 }
   0xc   :  { %p160_p6 = por %p159_p5, %p158_p4 }
   0xe   :  { %p161_p7 = pnand %p160_p6, %p154_p3 }
  0x10   :  { %164 = shalt.err (!%p161_p7)
}
  0x11   :  { %s204_s19 = smov 128   ;;  %s205_s20 = smov 8  }
  0x12   :  { %27 = dma.hbm_to_vmem [thread:$0]  %s259_s0, 256, %s22_s10, [#allocation4], %s204_s19, %s204_s19, %s205_s20  }
  0x13   :  { %s206_s23 = smov [#allocation6]   ;;  %s165_s27 = scalar_lea.hbm %s260_s1, 256 }
  0x14   :  { %s39_s24 = sshll.u32 %s206_s23, 4  ;;  %p166_p8 = scmp.ne.s32.totalorder %s260_s1, %s165_s27  ;;  %s40_s24 = int_to_ptr.vmem [resolvable:$true] %s39_s24 }
  0x15   :  { %p169_p9 = scmp.lt.u32.totalorder %s165_s27, %s260_s1 }
  0x17   :  { %p171_p10 = pnand %p169_p9, %p166_p8 }
  0x19   :  { %174 = shalt.err (!%p171_p10)
}
  0x1a   :  { %s175_s4 = scalar_lea.vmem %s40_s24, 256  ;;  %p180_p12 = scmp.lt.s32.totalorder %s40_s24, %s40_s24 }
  0x1b   :  { %p176_p11 = scmp.ne.s32.totalorder %s40_s24, %s175_s4  ;;  %p181_p13 = scmp.lt.s32.totalorder %s175_s4, %s175_s4 }
  0x1d   :  { %p182_p0 = por %p181_p13, %p180_p12 }
  0x1f   :  { %p183_p1 = pnand %p182_p0, %p176_p11 }
  0x21   :  { %186 = shalt.err (!%p183_p1)
}
  0x22   :  { %45 = dma.hbm_to_vmem [thread:$0]  %s260_s1, 256, %s40_s24, [#allocation7], %s204_s19, %s204_s19, %s205_s20  }
  0x23   :  { %197 = dma.done.wait [#allocation4], 256  }
  0x24   :  { %198 = vsyncadd [#allocation4], 4294967040 }
  0x25   :  { %199 = dma.done.wait [#allocation7], 256  }
  0x26   :  { %200 = vsyncadd [#allocation7], 4294967040  ;;  %v70_v0 = vld [vmem:[#allocation3] sm:$0xff]  ;;  %v71_v1 = vld [vmem:[#allocation3 + $0x8] sm:$0xff]  ;;  %s187_s8 = scalar_lea.hbm %s261_s2, 16 }
  0x27   :  { %v72_v2 = vld [vmem:[#allocation6] sm:$0xff]  ;;  %v73_v3 = vld [vmem:[#allocation6 + $0x8] sm:$0xff]  ;;  %p188_p2 = scmp.ne.s32.totalorder %s261_s2, %s187_s8  ;;  %p191_p3 = scmp.lt.u32.totalorder %s187_s8, %s261_s2 }
  0x28   :  { %v74_v4 = vsub.f32 %v70_v0, %v72_v2  ;;  %v75_v5 = vsub.f32 %v71_v1, %v73_v3 }
  0x29   :  { %p193_p4 = pnand %p191_p3, %p188_p2 }
  0x2a   :  { %v76_v6 = vmul.f32 %v74_v4, %v74_v4  ;;  %v77_v7 = vmul.f32 %v75_v5, %v75_v5 }
  0x2c   :  { %v78_v8 = vadd.f32 1e-06, %v76_v6  ;;  %v79_v9 = vadd.f32 1e-06, %v77_v7 }
  0x2e   :  { %139 = vrsqrt.f32 %v78_v8  ;;  %vm82_vm0 = vcmp.eq.f32.partialorder %v78_v8, inf  ;;  %v85_v11 = vand.u32 2147483648, %v78_v8  ;;  %vm84_vm1 = vcmp.eq.f32.partialorder %v78_v8, 0.0 }
  0x2f   :  { %141 = vrsqrt.f32 %v79_v9  ;;  %vm89_vm2 = vcmp.eq.f32.partialorder %v79_v9, inf  ;;  %v92_v14 = vand.u32 2147483648, %v79_v9  ;;  %vm91_vm3 = vcmp.eq.f32.partialorder %v79_v9, 0.0 }
  0x38   :  { %v140_v10 = vpop.eup %139 }
  0x39   :  { %v142_v12 = vpop.eup %141  ;;  %v81_v13 = vmul.f32 %v140_v10, %v78_v8 }
  0x3a   :  { %v88_v15 = vmul.f32 %v142_v12, %v79_v9 }
  0x3b   :  { %v83_v16 = vsel %vm82_vm0, %v78_v8, %v81_v13 }
  0x3c   :  { %v86_v17 = vsel %vm84_vm1, %v85_v11, %v83_v16  ;;  %v90_v18 = vsel %vm89_vm2, %v79_v9, %v88_v15 }
  0x3d   :  { %v93_v19 = vsel %vm91_vm3, %v92_v14, %v90_v18 }
  0x3e   :  { %v95_v20 = vadd.f32 %v93_v19, %v86_v17 }
  0x40   :  { %102 = vadd.xlane.f32.xlu0 %v95_v20 }
  0xcd   :  { %v103_v21 = vpop.xlane.xlu0 %102 }
  0xce   :  { %v104_v22 = vrot.slane %v103_v21, 4 }
  0xd0   :  { %v105_v23 = vadd.f32 %v104_v22, %v103_v21 }
  0xd2   :  { %v106_v24 = vrot.slane %v105_v23, 2 }
  0xd4   :  { %v107_v25 = vadd.f32 %v106_v24, %v105_v23 }
  0xd6   :  { %v108_v26 = vrot.slane %v107_v25, 1 }
  0xd8   :  { %v109_v27 = vadd.f32 %v108_v26, %v107_v25 }
  0xda   :  { %132 = vpush %v109_v27 }
 0x10b   :  { %s133_s1 = spop %132 }
 0x10c   :  { %112 = sst [smem:[#allocation8]] %s133_s1 }
 0x10d   :  { %196 = shalt.err (!%p193_p4)
}
 0x10e   :  { %s207_s13 = smov [#allocation8]  }
 0x10f   :  { %120 = dma.smem_to_hbm %s207_s13, 16, %s261_s2, [#allocation5]  }
 0x110   :  { %201 = dma.done.wait [#allocation5], 16  }
 0x111   :  { %202 = vsyncadd [#allocation5], 4294967280 }
 0x112   :  { %124 = sfence }
 0x113   :  { %125 = vsyncpa [#allocation4], 1 }
 0x114   :  { %126 = vsyncpa [#allocation7], 1 }
 0x115   :  { %127 = vsyncpa [#allocation5], 1 }

</bundles_post_ra>
